<compile_context>
chip_gen: v7x
topology: tpu7x:2x2x1
jax: 0.10.0
libtpu: 0.0.40
codegen_flags: <defaults>
</compile_context>

<pallas_src>
import jax
import jax.numpy as jnp
import numpy as np
from jax.experimental import pallas as pl
from jax.experimental.pallas import tpu as pltpu


# ---------------------------------------------------------------------------
# pe buffer construction (init-time, matches PositionalEncoding._pe)
# ---------------------------------------------------------------------------

def _make_pe(nx, ny, nt, num_channels, max_time_steps, time_exponential_scale, dtype):
    """JAX equivalent of PositionalEncoding._pe -> (1, C, nx, ny, nt)."""
    gridx = jnp.linspace(0.0, 1.0, nx)
    gridy = jnp.linspace(0.0, 1.0, ny)
    gridt = jnp.linspace(0.0, 1.0, max_time_steps + 1)[1:nt + 1]
    gx, gy, gt = jnp.meshgrid(gridx, gridy, gridt, indexing="ij")
    pe = [gx, gy, gt]
    for k in range(num_channels - 3):
        basis = jnp.sin if k % 2 == 0 else jnp.cos
        _gt = jnp.exp(time_exponential_scale * gridt) * basis(jnp.pi * (k + 1) * gridt)
        _gt = jnp.broadcast_to(_gt.reshape(1, 1, nt), (nx, ny, nt))
        pe.append(_gt)
    pe = jnp.stack(pe)[None]  # (1, C, nx, ny, nt)
    return pe.astype(dtype)


# ---------------------------------------------------------------------------
# Kernels
# ---------------------------------------------------------------------------

def _add_pe_small_kernel(v_ref, pe_ref, out_ref):
    # Single grid step (tiny problems): v (B,S), pe (C,S), out (B,C,S).
    out_ref[...] = v_ref[...][:, None, :] + pe_ref[...][None, :, :]


def _add_pe_tiled_kernel(v_ref, pe_ref, out_ref):
    # v_ref : (B, TS)  all batch rows of this S-tile (block index constant over b)
    # pe_ref: (C, TS)  pe tile (block index constant over b -> VMEM-resident)
    # out   : (C, TS)  output tile for batch row b (batch dim squeezed)
    b = pl.program_id(1)
    out_ref[...] = v_ref[pl.ds(b, 1), :] + pe_ref[...]   # (1,TS)+(C,TS) -> (C,TS)


# ---------------------------------------------------------------------------
# Tiling / VMEM helpers
# ---------------------------------------------------------------------------

def _round_up(x, m):
    return (x + m - 1) // m * m


def _vmem_config():
    """(double-buffered working-set budget, explicit scoped-VMEM limit) per gen."""
    kind = ""
    try:
        kind = jax.devices()[0].device_kind.lower()
    except Exception:
        pass
    if "v7" in kind:
        return 24 << 20, 40 << 20      # 64 MiB physical -> stay well under it
    if "v6" in kind:
        return 28 << 20, 64 << 20      # 128 MiB physical, 32 MiB scoped default
    if "v5" in kind:
        return 24 << 20, 48 << 20      # 16 MiB scoped default -> limit MUST be explicit
    return 20 << 20, 40 << 20          # unknown: conservative but explicit


def _choose_ts(S, B, C, itemsize, budget_bytes):
    """Lane tile size: multiple of 128, capped by the VMEM working-set budget."""
    s128 = _round_up(S, 128)
    per_elem = (2 * B + 4 * C) * itemsize   # dbl-buffered v(B,TS) + pe(C,TS) + out(C,TS)
    cap = max(128, (budget_bytes // per_elem) // 128 * 128)
    ts = min(cap, s128)
    # megacore friendliness (v7x has 2 TCs): avoid a (1, odd_B) grid on small problems
    if ts >= s128 and (B % 2 == 1) and s128 >= 256:
        ts = max(128, _round_up(s128 // 2, 128))
    return ts


# ---------------------------------------------------------------------------
# Forward
# ---------------------------------------------------------------------------

def positional_encoding_forward(v, pe_flat, *, small_path_max_bytes=2 * 1024 * 1024,
                                vmem_budget_bytes=None, vmem_limit_bytes=None):
    """forward(v) = v + pe (proj = Identity).

    v       : (B, 1, nx, ny, nt)
    pe_flat : (C, nx*ny*nt), already cast to v.dtype at init (hoisted preprocessing).
    """
    B, cv, nx, ny, nt = v.shape
    assert cv == 1, "input channel dim must be 1 (broadcast against C pe channels)"
    C, S_pe = pe_flat.shape
    S = nx * ny * nt
    assert S_pe == S, "pe was built for a different (nx, ny, nt)"
    itemsize = jnp.dtype(v.dtype).itemsize
    if pe_flat.dtype != v.dtype:          # normally a no-op: cast is hoisted to init
        pe_flat = pe_flat.astype(v.dtype)

    v2 = v.reshape(B, S)

    total_bytes = (B * S + C * S + B * C * S) * itemsize
    if total_bytes <= small_path_max_bytes:
        # Tiny problem: one grid step, whole arrays in VMEM (per-step overhead
        # would otherwise exceed the DMA time).
        out = pl.pallas_call(
            _add_pe_small_kernel,
            out_shape=jax.ShapeDtypeStruct((B, C, S), v.dtype),
        )(v2, pe_flat)
        return out.reshape(B, C, nx, ny, nt)

    budget, limit = _vmem_config()
    if vmem_budget_bytes is not None:
        budget = vmem_budget_bytes
    if vmem_limit_bytes is not None:
        limit = vmem_limit_bytes

    ts = _choose_ts(S, B, C, itemsize, budget)
    num_s = pl.cdiv(S, ts)
    if num_s == 1:
        ts = S   # single full-extent tile: always legal, no masked stores at all

    # Guard (large B*C): make sure the explicit limit covers the working set.
    working_set = (2 * B + 4 * C) * ts * itemsize
    limit = max(limit, working_set + (4 << 20))

    cost = pl.CostEstimate(
        flops=B * C * S,
        transcendentals=0,
        bytes_accessed=(B * C + B + C) * S * itemsize,
    )

    out = pl.pallas_call(
        _add_pe_tiled_kernel,
        out_shape=jax.ShapeDtypeStruct((B, C, S), v.dtype),
        grid_spec=pl.GridSpec(
            # B innermost: v's and pe's block index (0, s) is constant across the
            # inner axis, so both tiles stay VMEM-resident instead of re-DMAing
            # once per batch element; only the output tile streams every step.
            grid=(num_s, B),
            in_specs=[
                pl.BlockSpec((B, ts), lambda s, b: (0, s)),   # all batch rows, resident
                pl.BlockSpec((C, ts), lambda s, b: (0, s)),   # pe tile, resident over b
            ],
            out_specs=pl.BlockSpec((pl.Squeezed(), C, ts), lambda s, b: (b, 0, s)),
        ),
        compiler_params=pltpu.CompilerParams(
            dimension_semantics=("parallel", "parallel"),
            vmem_limit_bytes=int(limit)),
        cost_estimate=cost,
    )(v2, pe_flat)
    return out.reshape(B, C, nx, ny, nt)


# ---------------------------------------------------------------------------
# Module-like wrapper (hoists pe construction + cast + flatten out of forward)
# ---------------------------------------------------------------------------

class PositionalEncoding:
    def __init__(self, num_channels=20, input_shape=(64, 64, 10),
                 max_time_steps=100, time_exponential_scale=0.01,
                 dtype=jnp.float32):
        assert num_channels % 2 == 0 and num_channels > 3
        self.num_channels = num_channels
        self.max_time_steps = max_time_steps
        self.time_exponential_scale = time_exponential_scale
        self._cache = {}
        self._prepare(tuple(input_shape), dtype)

    def _prepare(self, shape, dtype):
        # Hoisted preprocessing: pe buffer built, cast to the activation dtype and
        # flattened to (C, S) ONCE, not on every forward call.
        key = (tuple(shape), jnp.dtype(dtype).name)
        if key not in self._cache:
            nx, ny, nt = shape
            pe = _make_pe(nx, ny, nt, self.num_channels, self.max_time_steps,
                          self.time_exponential_scale, dtype)          # (1,C,nx,ny,nt)
            self._cache[key] = pe.reshape(self.num_channels, nx * ny * nt)
        return self._cache[key]

    def __call__(self, v):
        B, cv, nx, ny, nt = v.shape
        pe_flat = self._prepare((nx, ny, nt), v.dtype)                  # pe.to(v.dtype)
        return positional_encoding_forward(v, pe_flat)


# TODO(synk): spatial_random_feats=True branch (pointwise nn.Conv3d projection of
# the expanded modes_x*modes_y*modes_t+3 basis) is not exercised by the default
# config and is not implemented here.
# TODO(synk): optional further win for tiny B / huge S: generate the pe tile
# in-kernel (VMEM scratch under @pl.when(b == 0)) to drop its HBM read entirely.

if __name__ == "__main__":
    # small shapes consistent with the module: (batch, 1, nx, ny, t)
    B, nx, ny, nt = 2, 16, 16, 8
    num_channels = 8                 # even and > 3, as asserted in __init__
    max_time_steps = 100
    time_exponential_scale = 0.01

    key = jax.random.PRNGKey(0)
    v = jax.random.normal(key, (B, 1, nx, ny, nt), dtype=jnp.float32)

    module = PositionalEncoding(num_channels=num_channels, input_shape=(nx, ny, nt),
                                max_time_steps=max_time_steps,
                                time_exponential_scale=time_exponential_scale,
                                dtype=v.dtype)
    pe_full = _make_pe(nx, ny, nt, num_channels, max_time_steps,
                       time_exponential_scale, v.dtype)       # (1,C,nx,ny,nt) reference
    ref = v + pe_full                                          # (B,1,...)+(1,C,...) -> (B,C,...)

    # 1) default path (tiny problem -> single-step kernel)
    out = jax.block_until_ready(module(v))
    np.testing.assert_allclose(np.asarray(out), np.asarray(ref), rtol=1e-6, atol=1e-6)
    assert out.shape == (B, num_channels, nx, ny, nt)

    pe_flat = module._prepare((nx, ny, nt), v.dtype)

    # 2) force the tiled path on the same shapes (single full-extent S tile,
    #    resident v/pe tiles, squeezed output block)
    out_t = jax.block_until_ready(
        positional_encoding_forward(v, pe_flat, small_path_max_bytes=0))
    np.testing.assert_allclose(np.asarray(out_t), np.asarray(ref), rtol=1e-6, atol=1e-6)

    # 3) tiled path with a small budget -> multiple full 128-aligned tiles
    out_m = jax.block_until_ready(
        positional_encoding_forward(v, pe_flat, small_path_max_bytes=0,
                                    vmem_budget_bytes=80_000))
    np.testing.assert_allclose(np.asarray(out_m), np.asarray(ref), rtol=1e-6, atol=1e-6)

    # 4) S not a multiple of 128 (S = 10*10*7 = 700): no host pad / post slice;
    #    default budget -> single full-extent tile
    nx2, ny2, nt2 = 10, 10, 7
    v_odd = jax.random.normal(jax.random.PRNGKey(1), (B, 1, nx2, ny2, nt2),
                              dtype=jnp.float32)
    pe_odd_full = _make_pe(nx2, ny2, nt2, num_channels, max_time_steps,
                           time_exponential_scale, v_odd.dtype)
    pe_odd_flat = pe_odd_full.reshape(num_channels, nx2 * ny2 * nt2)
    ref_odd = v_odd + pe_odd_full
    out_odd = jax.block_until_ready(
        positional_encoding_forward(v_odd, pe_odd_flat, small_path_max_bytes=0))
    np.testing.assert_allclose(np.asarray(out_odd), np.asarray(ref_odd),
                               rtol=1e-6, atol=1e-6)

    # 5) odd S with a tiny budget -> multiple tiles with a masked final partial
    #    tile (exercises the cdiv + boundary-masked store path)
    out_odd_m = jax.block_until_ready(
        positional_encoding_forward(v_odd, pe_odd_flat, small_path_max_bytes=0,
                                    vmem_budget_bytes=40_000))
    np.testing.assert_allclose(np.asarray(out_odd_m), np.asarray(ref_odd),
                               rtol=1e-6, atol=1e-6)

    print("KERNEL_OK")
</pallas_src>

<mosaic_0001>
module attributes {stable_mosaic.version = 11 : i64} {
  func.func @_add_pe_small_kernel(%arg0: memref<2x2048xf32, #tpu.memory_space<vmem>>, %arg1: memref<8x2048xf32, #tpu.memory_space<vmem>>, %arg2: memref<2x8x2048xf32, #tpu.memory_space<vmem>>) attributes {dimension_semantics = [], scalar_prefetch = 0 : i64, scratch_operands = 0 : i64, tpu.core_type = #tpu.core_type<tc>} {
    %c0 = arith.constant 0 : index
    %c0_0 = arith.constant 0 : index
    %0 = vector.load %arg0[%c0, %c0_0] : memref<2x2048xf32, #tpu.memory_space<vmem>>, vector<2x2048xf32>
    %1 = vector.shape_cast %0 : vector<2x2048xf32> to vector<2x1x2048xf32>
    %c0_1 = arith.constant 0 : index
    %c0_2 = arith.constant 0 : index
    %2 = vector.load %arg1[%c0_1, %c0_2] : memref<8x2048xf32, #tpu.memory_space<vmem>>, vector<8x2048xf32>
    %3 = vector.shape_cast %2 : vector<8x2048xf32> to vector<1x8x2048xf32>
    %4 = vector.broadcast %1 : vector<2x1x2048xf32> to vector<2x8x2048xf32>
    %5 = vector.broadcast %3 : vector<1x8x2048xf32> to vector<2x8x2048xf32>
    %6 = arith.addf %4, %5 : vector<2x8x2048xf32>
    %c0_3 = arith.constant 0 : index
    %c0_4 = arith.constant 0 : index
    %c0_5 = arith.constant 0 : index
    %7 = vector.load %arg2[%c0_3, %c0_4, %c0_5] : memref<2x8x2048xf32, #tpu.memory_space<vmem>>, vector<2x8x2048xf32>
    tpu.vector_store %arg2[%c0_3, %c0_4, %c0_5], %6 {strides = array<i32>} : memref<2x8x2048xf32, #tpu.memory_space<vmem>>, vector<2x8x2048xf32>,
    return
  }
}

</mosaic_0001>

<bundles_post_ra>
// kernel: tpu_custom_call.1
= control target key start
LH: loop header
LB: loop body
LE: loop exit
PB: predicated region body
PF: predicated region fallthrough
CT: control target
= control target key end

     0   :  { %7 = vsyncpa [#allocation3], 0  ;;  %s589_s0 = inlined_call_operand.hbm [shape: f32[2,2048], index: 0, kind: input, shape index: {}]   ;;  %s590_s1 = inlined_call_operand.hbm [shape: f32[8,2048], index: 1, kind: input, shape index: {}]   ;;  %s591_s2 = inlined_call_operand.hbm [shape: f32[2,8,2048], index: 2, kind: output, shape index: {}]  }
   0x1   :  { %8 = vsyncpa [#allocation6], 0 }
   0x2   :  { %9 = vsyncpa [#allocation4], 0  ;;  %s415_s9 = smov [#allocation2]   ;;  %s416_s11 = smov [#allocation5]  }
   0x3   :  { %s16_s10 = sshll.u32 %s415_s9, 4  ;;  %s26_s12 = sshll.u32 %s416_s11, 4  ;;  %s17_s10 = int_to_ptr.vmem [resolvable:$true] %s16_s10  ;;  %s27_s12 = int_to_ptr.vmem [resolvable:$true] %s26_s12 }
   0x4   :  { %s343_s15 = scalar_lea.hbm %s589_s0, 512 }
   0x5   :  { %p344_p0 = scmp.ne.s32.totalorder %s589_s0, %s343_s15  ;;  %p347_p1 = scmp.lt.u32.totalorder %s343_s15, %s589_s0 }
   0x7   :  { %p349_p2 = pnand %p347_p1, %p344_p0 }
   0x9   :  { %352 = shalt.err (!%p349_p2)
}
   0xa   :  { %s353_s20 = scalar_lea.vmem %s17_s10, 512  ;;  %p358_p4 = scmp.lt.s32.totalorder %s17_s10, %s17_s10 }
   0xb   :  { %p354_p3 = scmp.ne.s32.totalorder %s17_s10, %s353_s20  ;;  %p359_p5 = scmp.lt.s32.totalorder %s353_s20, %s353_s20 }
   0xd   :  { %p360_p6 = por %p359_p5, %p358_p4 }
   0xf   :  { %p361_p7 = pnand %p360_p6, %p354_p3 }
  0x11   :  { %364 = shalt.err (!%p361_p7)
}
  0x12   :  { %19 = dma.hbm_to_vmem [thread:$0]  %s589_s0, 512, %s17_s10, [#allocation3]  }
  0x13   :  { %s365_s25 = scalar_lea.hbm %s590_s1, 2048 }
  0x14   :  { %p366_p8 = scmp.ne.s32.totalorder %s590_s1, %s365_s25  ;;  %p369_p9 = scmp.lt.u32.totalorder %s365_s25, %s590_s1 }
  0x16   :  { %p371_p10 = pnand %p369_p9, %p366_p8 }
  0x18   :  { %374 = shalt.err (!%p371_p10)
}
  0x19   :  { %s375_s30 = scalar_lea.vmem %s27_s12, 2048  ;;  %p380_p12 = scmp.lt.s32.totalorder %s27_s12, %s27_s12 }
  0x1a   :  { %p376_p11 = scmp.ne.s32.totalorder %s27_s12, %s375_s30  ;;  %p381_p13 = scmp.lt.s32.totalorder %s375_s30, %s375_s30 }
  0x1c   :  { %p382_p0 = por %p381_p13, %p380_p12 }
  0x1e   :  { %p383_p1 = pnand %p382_p0, %p376_p11 }
  0x20   :  { %386 = shalt.err (!%p383_p1)
}
  0x21   :  { %29 = dma.hbm_to_vmem [thread:$0]  %s590_s1, 2048, %s27_s12, [#allocation6]  }
  0x22   :  { %409 = dma.done.wait [#allocation3], 512  }
  0x23   :  { %410 = vsyncadd [#allocation3], 4294966784 }
  0x24   :  { %411 = dma.done.wait [#allocation6], 2048  }
  0x25   :  { %412 = vsyncadd [#allocation6], 4294965248  ;;  %v92_v0 = vlaneseq  ;;  %v334_v10 = vld.sshfl [vmem:[#allocation2] sm:$0xff pattern:$0x75316420]  ;;  %v477_v14 = vld [vmem:[#allocation5 + $0x8] sm:$0xff] }
  0x26   :  { %v335_v11 = vld.sshfl [vmem:[#allocation2 + $0x8] sm:$0xff pattern:$0x75316420]  ;;  %v475_v13 = vld [vmem:[#allocation5] sm:$0xff]  ;;  %v479_v15 = vld [vmem:[#allocation5 + $0x10] sm:$0xff]  ;;  %s417_s1 = smov [#allocation7]  }
  0x27   :  { %v93_v1 = vshrl.u32 %v92_v0, 7  ;;  %v58_v12 = vcombine.low %v334_v10, %v335_v11  ;;  %v481_v16 = vld [vmem:[#allocation5 + $0x18] sm:$0xff]  ;;  %v483_v17 = vld [vmem:[#allocation5 + $0x20] sm:$0xff]  ;;  %v485_v18 = vcombine.high %v334_v10, %v335_v11  ;;  %v491_v23 = vld [vmem:[#allocation5 + $0x28] sm:$0xff]  ;;  %s321_s4 = sshll.u32 %s417_s1, 4  ;;  %s322_s4 = int_to_ptr.vmem [resolvable:$true] %s321_s4 }
  0x28   :  { %v493_v24 = vld [vmem:[#allocation5 + $0x30] sm:$0xff]  ;;  %v495_v25 = vld [vmem:[#allocation5 + $0x38] sm:$0xff]  ;;  %v515_v41 = vld [vmem:[#allocation5 + $0x40] sm:$0xff]  ;;  %s387_s5 = scalar_lea.vmem %s322_s4, 4096  ;;  %p392_p3 = scmp.lt.s32.totalorder %s322_s4, %s322_s4 }
  0x29   :  { %v459_v2 = vsub.s32 0, %v93_v1  ;;  %v461_v3 = vsub.s32 1, %v93_v1  ;;  %v463_v4 = vsub.s32 2, %v93_v1  ;;  %v465_v5 = vsub.s32 3, %v93_v1  ;;  %v517_v42 = vld [vmem:[#allocation5 + $0x48] sm:$0xff]  ;;  %v525_v46 = vld [vmem:[#allocation5 + $0x50] sm:$0xff]  ;;  %p388_p2 = scmp.ne.s32.totalorder %s322_s4, %s387_s5  ;;  %p393_p4 = scmp.lt.s32.totalorder %s387_s5, %s387_s5 }
  0x2a   :  { %v467_v6 = vsub.s32 4, %v93_v1  ;;  %v469_v7 = vsub.s32 5, %v93_v1  ;;  %v471_v8 = vsub.s32 6, %v93_v1  ;;  %v473_v9 = vsub.s32 7, %v93_v1  ;;  %v527_v47 = vld [vmem:[#allocation5 + $0x58] sm:$0xff]  ;;  %v529_v48 = vld [vmem:[#allocation5 + $0x60] sm:$0xff] }
  0x2b   :  { %v95_v19 = vrot.slane %v58_v12, %v459_v2  ;;  %v99_v20 = vrot.slane %v58_v12, %v461_v3  ;;  %v103_v21 = vrot.slane %v58_v12, %v463_v4  ;;  %v107_v22 = vrot.slane %v58_v12, %v465_v5  ;;  %v501_v30 = vld.sshfl [vmem:[#allocation2 + $0x10] sm:$0xff pattern:$0x75316420]  ;;  %v503_v31 = vld.sshfl [vmem:[#allocation2 + $0x18] sm:$0xff pattern:$0x75316420]  ;;  %p394_p5 = por %p393_p4, %p392_p3 }
  0x2c   :  { %v111_v26 = vrot.slane %v58_v12, %v467_v6  ;;  %v115_v27 = vrot.slane %v58_v12, %v469_v7  ;;  %v119_v28 = vrot.slane %v58_v12, %v471_v8  ;;  %v123_v29 = vrot.slane %v58_v12, %v473_v9  ;;  %v89_v57 = vld [vmem:[#allocation5 + $0x68] sm:$0xff]  ;;  %v90_v58 = vld [vmem:[#allocation5 + $0x70] sm:$0xff]  ;;  %v91_v59 = vld [vmem:[#allocation5 + $0x78] sm:$0xff] }
  0x2d   :  { %v252_v32 = vadd.f32 %v95_v19, %v475_v13  ;;  %v253_v33 = vadd.f32 %v99_v20, %v477_v14  ;;  %v254_v34 = vadd.f32 %v103_v21, %v479_v15  ;;  %v255_v35 = vadd.f32 %v107_v22, %v481_v16  ;;  %p395_p6 = pnand %p394_p5, %p388_p2 }
  0x2e   :  { %v256_v36 = vadd.f32 %v111_v26, %v483_v17  ;;  %v257_v37 = vadd.f32 %v115_v27, %v491_v23  ;;  %v258_v38 = vadd.f32 %v119_v28, %v493_v24  ;;  %v259_v39 = vadd.f32 %v123_v29, %v495_v25 }
  0x2f   :  { %284 = vst [vmem:[#allocation7] sm:$0xff] %v252_v32  ;;  %285 = vst [vmem:[#allocation7 + $0x8] sm:$0xff] %v253_v33  ;;  %v74_v40 = vcombine.low %v501_v30, %v503_v31  ;;  %v159_v43 = vrot.slane %v485_v18, %v459_v2  ;;  %v163_v44 = vrot.slane %v485_v18, %v461_v3 }
  0x30   :  { %286 = vst [vmem:[#allocation7 + $0x10] sm:$0xff] %v254_v34  ;;  %287 = vst [vmem:[#allocation7 + $0x18] sm:$0xff] %v255_v35  ;;  %v167_v45 = vrot.slane %v485_v18, %v463_v4  ;;  %v171_v49 = vrot.slane %v485_v18, %v465_v5  ;;  %v175_v50 = vrot.slane %v485_v18, %v467_v6 }
  0x31   :  { %288 = vst [vmem:[#allocation7 + $0x20] sm:$0xff] %v256_v36  ;;  %289 = vst [vmem:[#allocation7 + $0x28] sm:$0xff] %v257_v37  ;;  %v179_v51 = vrot.slane %v485_v18, %v469_v7  ;;  %v183_v52 = vrot.slane %v485_v18, %v471_v8  ;;  %v127_v53 = vrot.slane %v74_v40, %v459_v2 }
  0x32   :  { %290 = vst [vmem:[#allocation7 + $0x30] sm:$0xff] %v258_v38  ;;  %291 = vst [vmem:[#allocation7 + $0x38] sm:$0xff] %v259_v39  ;;  %v131_v54 = vrot.slane %v74_v40, %v461_v3  ;;  %v135_v55 = vrot.slane %v74_v40, %v463_v4  ;;  %v139_v56 = vrot.slane %v74_v40, %v465_v5 }
  0x33   :  { %v143_v60 = vrot.slane %v74_v40, %v467_v6  ;;  %v147_v61 = vrot.slane %v74_v40, %v469_v7  ;;  %v151_v62 = vrot.slane %v74_v40, %v471_v8  ;;  %v155_v63 = vrot.slane %v74_v40, %v473_v9 }
  0x34   :  { %v260_v0 = vadd.f32 %v127_v53, %v515_v41  ;;  %v261_v1 = vadd.f32 %v131_v54, %v517_v42  ;;  %v262_v10 = vadd.f32 %v135_v55, %v525_v46  ;;  %v263_v11 = vadd.f32 %v139_v56, %v527_v47 }
  0x35   :  { %v264_v12 = vadd.f32 %v143_v60, %v529_v48  ;;  %v265_v19 = vadd.f32 %v147_v61, %v89_v57  ;;  %v266_v20 = vadd.f32 %v151_v62, %v90_v58  ;;  %v267_v21 = vadd.f32 %v155_v63, %v91_v59 }
  0x36   :  { %292 = vst [vmem:[#allocation7 + $0x40] sm:$0xff] %v260_v0  ;;  %293 = vst [vmem:[#allocation7 + $0x48] sm:$0xff] %v261_v1  ;;  %v268_v22 = vadd.f32 %v159_v43, %v475_v13  ;;  %v269_v26 = vadd.f32 %v163_v44, %v477_v14  ;;  %v270_v27 = vadd.f32 %v167_v45, %v479_v15 }
  0x37   :  { %294 = vst [vmem:[#allocation7 + $0x50] sm:$0xff] %v262_v10  ;;  %295 = vst [vmem:[#allocation7 + $0x58] sm:$0xff] %v263_v11  ;;  %v271_v28 = vadd.f32 %v171_v49, %v481_v16  ;;  %v272_v29 = vadd.f32 %v175_v50, %v483_v17  ;;  %v273_v32 = vadd.f32 %v179_v51, %v491_v23 }
  0x38   :  { %296 = vst [vmem:[#allocation7 + $0x60] sm:$0xff] %v264_v12  ;;  %297 = vst [vmem:[#allocation7 + $0x68] sm:$0xff] %v265_v19  ;;  %v274_v33 = vadd.f32 %v183_v52, %v493_v24  ;;  %v187_v34 = vrot.slane %v485_v18, %v473_v9  ;;  %v75_v13 = vcombine.high %v501_v30, %v503_v31 }
  0x39   :  { %298 = vst [vmem:[#allocation7 + $0x70] sm:$0xff] %v266_v20  ;;  %299 = vst [vmem:[#allocation7 + $0x78] sm:$0xff] %v267_v21 }
  0x3a   :  { %300 = vst [vmem:[#allocation7 + $0x80] sm:$0xff] %v268_v22  ;;  %301 = vst [vmem:[#allocation7 + $0x88] sm:$0xff] %v269_v26  ;;  %v275_v14 = vadd.f32 %v187_v34, %v495_v25  ;;  %v191_v15 = vrot.slane %v75_v13, %v459_v2  ;;  %v195_v16 = vrot.slane %v75_v13, %v461_v3 }
  0x3b   :  { %302 = vst [vmem:[#allocation7 + $0x90] sm:$0xff] %v270_v27  ;;  %303 = vst [vmem:[#allocation7 + $0x98] sm:$0xff] %v271_v28  ;;  %v199_v17 = vrot.slane %v75_v13, %v463_v4  ;;  %v203_v18 = vrot.slane %v75_v13, %v465_v5  ;;  %v207_v23 = vrot.slane %v75_v13, %v467_v6 }
  0x3c   :  { %304 = vst [vmem:[#allocation7 + $0xa0] sm:$0xff] %v272_v29  ;;  %305 = vst [vmem:[#allocation7 + $0xa8] sm:$0xff] %v273_v32  ;;  %v211_v24 = vrot.slane %v75_v13, %v469_v7  ;;  %v215_v30 = vrot.slane %v75_v13, %v471_v8  ;;  %v219_v31 = vrot.slane %v75_v13, %v473_v9 }
  0x3d   :  { %306 = vst [vmem:[#allocation7 + $0xb0] sm:$0xff] %v274_v33  ;;  %307 = vst [vmem:[#allocation7 + $0xb8] sm:$0xff] %v275_v14  ;;  %v276_v25 = vadd.f32 %v191_v15, %v515_v41  ;;  %v277_v2 = vadd.f32 %v195_v16, %v517_v42  ;;  %v278_v3 = vadd.f32 %v199_v17, %v525_v46 }
  0x3e   :  { %v279_v4 = vadd.f32 %v203_v18, %v527_v47  ;;  %v280_v5 = vadd.f32 %v207_v23, %v529_v48  ;;  %v281_v35 = vadd.f32 %v211_v24, %v89_v57  ;;  %v282_v36 = vadd.f32 %v215_v30, %v90_v58 }
  0x3f   :  { %v283_v37 = vadd.f32 %v219_v31, %v91_v59  ;;  %308 = vst [vmem:[#allocation7 + $0xc0] sm:$0xff] %v276_v25  ;;  %309 = vst [vmem:[#allocation7 + $0xc8] sm:$0xff] %v277_v2 }
  0x40   :  { %310 = vst [vmem:[#allocation7 + $0xd0] sm:$0xff] %v278_v3  ;;  %311 = vst [vmem:[#allocation7 + $0xd8] sm:$0xff] %v279_v4 }
  0x41   :  { %312 = vst [vmem:[#allocation7 + $0xe0] sm:$0xff] %v280_v5  ;;  %313 = vst [vmem:[#allocation7 + $0xe8] sm:$0xff] %v281_v35 }
  0x42   :  { %314 = vst [vmem:[#allocation7 + $0xf0] sm:$0xff] %v282_v36  ;;  %315 = vst [vmem:[#allocation7 + $0xf8] sm:$0xff] %v283_v37 }
  0x43   :  { %398 = shalt.err (!%p395_p6)
}
  0x44   :  { %s399_s8 = scalar_lea.hbm %s591_s2, 4096 }
  0x45   :  { %p400_p7 = scmp.ne.s32.totalorder %s591_s2, %s399_s8  ;;  %p403_p8 = scmp.lt.u32.totalorder %s399_s8, %s591_s2 }
  0x47   :  { %p405_p9 = pnand %p403_p8, %p400_p7 }
  0x49   :  { %408 = shalt.err (!%p405_p9)
}
  0x4a   :  { %s418_s13 = smov 2048   ;;  %s419_s14 = smov 128  }
  0x4b   :  { %327 = dma.vmem_to_hbm [thread:$0]  %s322_s4, 4096, %s591_s2, [#allocation4], %s418_s13, %s418_s13, %s419_s14  }
  0x4c   :  { %413 = dma.done.wait [#allocation4], 4096  }
  0x4d   :  { %414 = vsyncadd [#allocation4], 4294963200 }
  0x4e   :  { %331 = vsyncpa [#allocation3], 1 }
  0x4f   :  { %332 = vsyncpa [#allocation6], 1 }
  0x50   :  { %333 = vsyncpa [#allocation4], 1 }

</bundles_post_ra>
